<compile_context>
chip_gen: v7x
topology: tpu7x:2x2x1
jax: 0.10.0
libtpu: 0.0.40
codegen_flags: <defaults>
</compile_context>

<pallas_src>
import functools

import jax
import jax.numpy as jnp
from jax import lax
from jax.experimental import pallas as pl
from jax.experimental.pallas import tpu as pltpu


def _round_up(v, m):
    return (v + m - 1) // m * m


def _seg_mean_kernel(batch_ref, x_ref, inv_ref, o_ref, acc_ref, *, n_nodes):
    """One node tile of the segmented mean.

    Grid = (node_tiles,).  acc_ref is the (G, D) f32 accumulator scratch; the
    output block (constant block index, VMEM-resident) is written once, on the
    last tile, already normalized and cast to the model dtype.
    """
    i = pl.program_id(0)

    @pl.when(i == 0)
    def _():
        acc_ref[...] = jnp.zeros_like(acc_ref)

    b = batch_ref[...]                        # (1, TN) int32 graph ids
    x_tile = x_ref[...]                       # (TN, D) model dtype
    tn = x_tile.shape[0]
    num_graphs = acc_ref.shape[0]

    # onehot[g, n] = 1 iff node n of this tile belongs to graph g.  Built in
    # x's dtype so a bf16 model uses a single native bf16 MXU pass.
    gid = lax.broadcasted_iota(jnp.int32, (num_graphs, tn), 0)
    onehot = b == gid                         # (G, TN) bool

    if n_nodes % tn != 0:
        # Last tile is ragged: its trailing rows read past the end of x/batch
        # (undefined contents).  Mask them out of the one-hot and zero the x
        # rows so stray NaN/Inf garbage cannot poison the accumulation.
        base = i * tn
        col_ok = (lax.broadcasted_iota(jnp.int32, (1, tn), 1) + base) < n_nodes
        row_ok = (lax.broadcasted_iota(jnp.int32, (tn, 1), 0) + base) < n_nodes
        onehot = jnp.logical_and(onehot, col_ok)
        x_tile = jnp.where(row_ok, x_tile, jnp.zeros_like(x_tile))

    # acc[g, d] += sum_n onehot[g, n] * x[n, d]  (one (G,TN)x(TN,D) MXU op)
    acc_ref[...] += lax.dot_general(
        onehot.astype(x_tile.dtype), x_tile,
        (((1,), (0,)), ((), ())),
        preferred_element_type=jnp.float32)

    @pl.when(i == pl.num_programs(0) - 1)
    def _():
        o_ref[...] = (acc_ref[...] * inv_ref[...]).astype(o_ref.dtype)


@functools.partial(
    jax.jit, static_argnames=("num_graphs", "tile_nodes", "multi_buffer"))
def pool_wrapper_forward(x, batch, *, num_graphs, tile_nodes=1024,
                         multi_buffer=True):
    """Pallas implementation of PoolWrapper(mean-pool).forward(x, batch).

    x:      [N, D]  node features (f32 or bf16)
    batch:  [N]     int graph id per node (0..num_graphs-1, consecutive)
    returns [num_graphs, D] in x.dtype
    """
    n, d = x.shape
    assert batch.shape == (n,)
    batch = batch.astype(jnp.int32)

    # Per-graph inverse counts depend only on `batch`: one cheap XLA
    # segment_sum here; consumed in-kernel on the last tile.
    cnts = jax.ops.segment_sum(
        jnp.ones((n,), jnp.float32), batch, num_segments=num_graphs)
    inv_cnt = (1.0 / jnp.maximum(cnts, 1.0)).reshape(num_graphs, 1)

    # ---- node tile --------------------------------------------------------
    if n <= tile_nodes:
        tn = n                                   # single full-extent tile
    else:
        tn = max(128, tile_nodes // 128 * 128)   # lane- and pack-aligned

    # ---- generation-aware VMEM budget --------------------------------------
    x_item = jnp.dtype(x.dtype).itemsize
    phys_vmem = 64 * 1024 * 1024                 # conservative fallback (v7x)
    try:
        phys_vmem = int(pltpu.get_tpu_info().vmem_capacity_bytes)
    except Exception:
        pass
    cap = min(int(phys_vmem * 0.85), 112 * 1024 * 1024)

    d_pad = _round_up(d, 128)
    g_pad = _round_up(num_graphs, 8)

    def vmem_need(tn_, x_bufs):
        return (x_bufs * _round_up(tn_, 8) * d_pad * x_item      # x stream
                + 2 * 8 * _round_up(tn_, 128) * 4                # (1,TN) ids
                + 2 * g_pad * 128 * 4                            # (G,1) inv
                + 2 * g_pad * d_pad * x_item                     # (G,D) out
                + g_pad * d_pad * 4)                             # f32 acc

    while n > tn and tn > 128 and vmem_need(tn, 2) > cap:
        tn = max(128, (tn // 2) // 128 * 128)
    # TODO(synk): if even the minimal tile exceeds the budget (huge
    # num_graphs * D accumulator), add a D-tiling grid axis with a resident
    # (G, td) accumulator per feature block.

    grid_n = pl.cdiv(n, tn)

    x_bufs = 3 if (multi_buffer and grid_n >= 4
                   and vmem_need(tn, 3) <= cap) else 2
    vmem_limit = int(min(cap, max(vmem_need(tn, x_bufs) + (4 << 20),
                                  32 * 1024 * 1024)))

    # ---- block specs --------------------------------------------------------
    if x_bufs != 2:
        try:
            x_spec = pl.BlockSpec((tn, d), lambda i: (i, 0),
                                  pipeline_mode=pl.Buffered(x_bufs))
        except TypeError:                        # jax without pipeline_mode
            x_spec = pl.BlockSpec((tn, d), lambda i: (i, 0))
    else:
        x_spec = pl.BlockSpec((tn, d), lambda i: (i, 0))

    batch2d = batch.reshape(1, n)                # lane-dense id stream

    out = pl.pallas_call(
        functools.partial(_seg_mean_kernel, n_nodes=n),
        out_shape=jax.ShapeDtypeStruct((num_graphs, d), x.dtype),
        grid_spec=pltpu.PrefetchScalarGridSpec(
            num_scalar_prefetch=0,
            grid=(grid_n,),
            in_specs=[
                pl.BlockSpec((1, tn), lambda i: (0, i)),
                x_spec,
                pl.BlockSpec((num_graphs, 1), lambda i: (0, 0)),
            ],
            out_specs=pl.BlockSpec((num_graphs, d), lambda i: (0, 0)),
            scratch_shapes=[pltpu.VMEM((num_graphs, d), jnp.float32)],
        ),
        compiler_params=pltpu.CompilerParams(
            dimension_semantics=("arbitrary",),
            vmem_limit_bytes=vmem_limit),
    )(batch2d, x, inv_cnt)
    return out


def _reference(x, batch, num_graphs):
    """Pure-JAX reference: unbatch -> mean pool each segment -> concat."""
    xf = x.astype(jnp.float32)
    sums = jax.ops.segment_sum(xf, batch, num_segments=num_graphs)
    cnts = jax.ops.segment_sum(jnp.ones((x.shape[0],), jnp.float32), batch,
                               num_segments=num_graphs)
    return (sums / jnp.maximum(cnts, 1.0)[:, None]).astype(x.dtype)


def _run(x, batch, num_graphs, **kw):
    try:
        return jax.block_until_ready(
            pool_wrapper_forward(x, batch, num_graphs=num_graphs, **kw))
    except Exception:
        if kw.get("multi_buffer", True):
            # Retry without the optional Buffered(3) pipeline mode.
            kw2 = dict(kw)
            kw2["multi_buffer"] = False
            return jax.block_until_ready(
                pool_wrapper_forward(x, batch, num_graphs=num_graphs, **kw2))
        raise


if __name__ == "__main__":
    key = jax.random.PRNGKey(0)
    k1, k2 = jax.random.split(key)

    # --- Test 1: small, module-faithful shapes (f32, single node tile). ----
    N1, D1, G1 = 16, 32, 5            # graph 4 intentionally empty
    x1 = jax.random.normal(k1, (N1, D1), dtype=jnp.float32)
    # Consecutive graph ids, as required by torch_geometric.utils.unbatch.
    batch1 = jnp.array([0, 0, 0, 0, 0,
                        1, 1, 1,
                        2, 2, 2, 2,
                        3, 3, 3, 3], dtype=jnp.int32)
    out1 = _run(x1, batch1, G1)
    ref1 = _reference(x1, batch1, G1)
    assert out1.shape == (G1, D1), out1.shape
    assert jnp.allclose(out1, ref1, atol=1e-5, rtol=1e-5), "test1 mismatch"

    # --- Test 2: multi-tile grid with ragged tail, bf16 inputs. ------------
    N2, D2, G2 = 600, 96, 7
    sizes = [100, 37, 150, 3, 120, 90, 100]          # sums to 600
    batch2 = jnp.repeat(jnp.arange(G2, dtype=jnp.int32),
                        jnp.array(sizes, dtype=jnp.int32))
    x2 = jax.random.normal(k2, (N2, D2), dtype=jnp.bfloat16)
    out2 = _run(x2, batch2, G2, tile_nodes=128)      # 5 node tiles, last ragged
    ref2 = _reference(x2, batch2, G2)
    assert out2.shape == (G2, D2), out2.shape
    assert jnp.allclose(out2.astype(jnp.float32), ref2.astype(jnp.float32),
                        atol=2e-2, rtol=2e-2), "test2 mismatch"

    print("KERNEL_OK")
</pallas_src>

<mosaic_0001>
module attributes {stable_mosaic.version = 11 : i64} {
  func.func private @main(%arg0: i32) attributes {dimension_semantics = [#tpu.dimension_semantics<core_parallel>], iteration_bounds = array<i64: 2>, tpu.core_type = #tpu.core_type<sc_scalar_subcore>, window_params = []} {
    return
  }
}

module attributes {stable_mosaic.version = 11 : i64} {
  func.func private @main(%arg0: i32) attributes {dimension_semantics = [#tpu.dimension_semantics<core_parallel>], iteration_bounds = array<i64: 2>, tpu.core_type = #tpu.core_type<sc_scalar_subcore>, window_params = []} {
    return
  }
}

module attributes {stable_mosaic.version = 11 : i64} {
  func.func @_seg_mean_kernel(%arg0: i32, %arg1: memref<1x16xi32, #tpu.memory_space<vmem>>, %arg2: memref<16x32xf32, #tpu.memory_space<vmem>>, %arg3: memref<5x1xf32, #tpu.memory_space<vmem>>, %arg4: memref<5x32xf32, #tpu.memory_space<vmem>>, %arg5: memref<5x32xf32, #tpu.memory_space<vmem>>) attributes {dimension_semantics = [#tpu.dimension_semantics<arbitrary>], iteration_bounds = array<i64: 1>, scalar_prefetch = 0 : i64, scratch_operands = 1 : i64, tpu.core_type = #tpu.core_type<tc>, window_params = [{transform_indices = @transform_0, window_bounds = array<i64: 1, 16>}, {transform_indices = @transform_1, window_bounds = array<i64: 16, 32>}, {pipeline_mode = #tpu.pipeline_mode<synchronous>, transform_indices = @transform_2, window_bounds = array<i64: 5, 1>}, {pipeline_mode = #tpu.pipeline_mode<synchronous>, transform_indices = @transform_3, window_bounds = array<i64: 5, 32>}]} {
    %c0_i32 = arith.constant 0 : i32
    %0 = arith.cmpi eq, %arg0, %c0_i32 : i32
    %1 = arith.extui %0 : i1 to i32
    %c0_i32_0 = arith.constant 0 : i32
    %2 = arith.cmpi ne, %1, %c0_i32_0 : i32
    scf.if %2 {
      %cst_10 = arith.constant 0.000000e+00 : f32
      %17 = vector.broadcast %cst_10 : f32 to vector<5x32xf32>
      %c0_11 = arith.constant 0 : index
      %c0_12 = arith.constant 0 : index
      %18 = vector.load %arg5[%c0_11, %c0_12] : memref<5x32xf32, #tpu.memory_space<vmem>>, vector<5x32xf32>
      tpu.vector_store %arg5[%c0_11, %c0_12], %17 {strides = array<i32>} : memref<5x32xf32, #tpu.memory_space<vmem>>, vector<5x32xf32>,
    } else {
    }
    %c0 = arith.constant 0 : index
    %c0_1 = arith.constant 0 : index
    %3 = vector.load %arg1[%c0, %c0_1] : memref<1x16xi32, #tpu.memory_space<vmem>>, vector<1x16xi32>
    %c0_2 = arith.constant 0 : index
    %c0_3 = arith.constant 0 : index
    %4 = vector.load %arg2[%c0_2, %c0_3] : memref<16x32xf32, #tpu.memory_space<vmem>>, vector<16x32xf32>
    %5 = tpu.iota {dimensions = array<i32: 0>} : vector<5x16xi32>
    %6 = vector.broadcast %3 : vector<1x16xi32> to vector<5x16xi32>
    %7 = arith.cmpi eq, %6, %5 : vector<5x16xi32>
    %c0_4 = arith.constant 0 : index
    %c0_5 = arith.constant 0 : index
    %8 = vector.load %arg5[%c0_4, %c0_5] : memref<5x32xf32, #tpu.memory_space<vmem>>, vector<5x32xf32>
    %9 = arith.extui %7 : vector<5x16xi1> to vector<5x16xi32>
    %10 = arith.sitofp %9 : vector<5x16xi32> to vector<5x16xf32>
    %cst = arith.constant dense<0.000000e+00> : vector<5x32xf32>
    %11 = tpu.matmul %10, %4, %cst {dimension_numbers = #tpu.dot_dimension_numbers<[1], [0], [0], [1], [0, 0, 1, 1], [], []>} : vector<5x16xf32>, vector<16x32xf32>, vector<5x32xf32> -> vector<5x32xf32>
    %12 = arith.addf %8, %11 : vector<5x32xf32>
    %c0_6 = arith.constant 0 : index
    %c0_7 = arith.constant 0 : index
    %13 = vector.load %arg5[%c0_6, %c0_7] : memref<5x32xf32, #tpu.memory_space<vmem>>, vector<5x32xf32>
    tpu.vector_store %arg5[%c0_6, %c0_7], %12 {strides = array<i32>} : memref<5x32xf32, #tpu.memory_space<vmem>>, vector<5x32xf32>,
    %c0_i32_8 = arith.constant 0 : i32
    %14 = arith.cmpi eq, %arg0, %c0_i32_8 : i32
    %15 = arith.extui %14 : i1 to i32
    %c0_i32_9 = arith.constant 0 : i32
    %16 = arith.cmpi ne, %15, %c0_i32_9 : i32
    scf.if %16 {
      %c0_10 = arith.constant 0 : index
      %c0_11 = arith.constant 0 : index
      %17 = vector.load %arg5[%c0_10, %c0_11] : memref<5x32xf32, #tpu.memory_space<vmem>>, vector<5x32xf32>
      %c0_12 = arith.constant 0 : index
      %c0_13 = arith.constant 0 : index
      %18 = vector.load %arg3[%c0_12, %c0_13] : memref<5x1xf32, #tpu.memory_space<vmem>>, vector<5x1xf32>
      %19 = vector.broadcast %18 : vector<5x1xf32> to vector<5x32xf32>
      %20 = arith.mulf %17, %19 : vector<5x32xf32>
      %c0_14 = arith.constant 0 : index
      %c0_15 = arith.constant 0 : index
      %21 = vector.load %arg4[%c0_14, %c0_15] : memref<5x32xf32, #tpu.memory_space<vmem>>, vector<5x32xf32>
      tpu.vector_store %arg4[%c0_14, %c0_15], %20 {strides = array<i32>} : memref<5x32xf32, #tpu.memory_space<vmem>>, vector<5x32xf32>,
    } else {
    }
    return
  }
  func.func @transform_0(%arg0: i32) -> (i32, i32) {
    %c0_i32 = arith.constant 0 : i32
    %c0_i32_0 = arith.constant 0 : i32
    return %c0_i32, %arg0 : i32, i32
  }
  func.func @transform_1(%arg0: i32) -> (i32, i32) {
    %c0_i32 = arith.constant 0 : i32
    %c0_i32_0 = arith.constant 0 : i32
    return %arg0, %c0_i32 : i32, i32
  }
  func.func @transform_2(%arg0: i32) -> (i32, i32) {
    %c0_i32 = arith.constant 0 : i32
    %c0_i32_0 = arith.constant 0 : i32
    %c0_i32_1 = arith.constant 0 : i32
    return %c0_i32, %c0_i32_0 : i32, i32
  }
  func.func @transform_3(%arg0: i32) -> (i32, i32) {
    %c0_i32 = arith.constant 0 : i32
    %c0_i32_0 = arith.constant 0 : i32
    %c0_i32_1 = arith.constant 0 : i32
    return %c0_i32, %c0_i32_0 : i32, i32
  }
}

module attributes {stable_mosaic.version = 11 : i64} {
  func.func private @main(%arg0: i32) attributes {dimension_semantics = [#tpu.dimension_semantics<core_parallel>], iteration_bounds = array<i64: 2>, tpu.core_type = #tpu.core_type<sc_scalar_subcore>, window_params = []} {
    return
  }
}

module attributes {stable_mosaic.version = 11 : i64} {
  func.func private @main(%arg0: i32) attributes {dimension_semantics = [#tpu.dimension_semantics<core_parallel>], iteration_bounds = array<i64: 2>, tpu.core_type = #tpu.core_type<sc_scalar_subcore>, window_params = []} {
    return
  }
}

module attributes {stable_mosaic.version = 11 : i64} {
  func.func @_seg_mean_kernel(%arg0: i32, %arg1: memref<1x16xi32, #tpu.memory_space<vmem>>, %arg2: memref<16x32xf32, #tpu.memory_space<vmem>>, %arg3: memref<5x1xf32, #tpu.memory_space<vmem>>, %arg4: memref<5x32xf32, #tpu.memory_space<vmem>>, %arg5: memref<5x32xf32, #tpu.memory_space<vmem>>) attributes {dimension_semantics = [#tpu.dimension_semantics<arbitrary>], iteration_bounds = array<i64: 1>, scalar_prefetch = 0 : i64, scratch_operands = 1 : i64, tpu.core_type = #tpu.core_type<tc>, window_params = [{transform_indices = @transform_0, window_bounds = array<i64: 1, 16>}, {transform_indices = @transform_1, window_bounds = array<i64: 16, 32>}, {pipeline_mode = #tpu.pipeline_mode<synchronous>, transform_indices = @transform_2, window_bounds = array<i64: 5, 1>}, {pipeline_mode = #tpu.pipeline_mode<synchronous>, transform_indices = @transform_3, window_bounds = array<i64: 5, 32>}]} {
    %c0_i32 = arith.constant 0 : i32
    %0 = arith.cmpi eq, %arg0, %c0_i32 : i32
    %1 = arith.extui %0 : i1 to i32
    %c0_i32_0 = arith.constant 0 : i32
    %2 = arith.cmpi ne, %1, %c0_i32_0 : i32
    scf.if %2 {
      %cst_10 = arith.constant 0.000000e+00 : f32
      %17 = vector.broadcast %cst_10 : f32 to vector<5x32xf32>
      %c0_11 = arith.constant 0 : index
      %c0_12 = arith.constant 0 : index
      %18 = vector.load %arg5[%c0_11, %c0_12] : memref<5x32xf32, #tpu.memory_space<vmem>>, vector<5x32xf32>
      tpu.vector_store %arg5[%c0_11, %c0_12], %17 {strides = array<i32>} : memref<5x32xf32, #tpu.memory_space<vmem>>, vector<5x32xf32>,
    } else {
    }
    %c0 = arith.constant 0 : index
    %c0_1 = arith.constant 0 : index
    %3 = vector.load %arg1[%c0, %c0_1] : memref<1x16xi32, #tpu.memory_space<vmem>>, vector<1x16xi32>
    %c0_2 = arith.constant 0 : index
    %c0_3 = arith.constant 0 : index
    %4 = vector.load %arg2[%c0_2, %c0_3] : memref<16x32xf32, #tpu.memory_space<vmem>>, vector<16x32xf32>
    %5 = tpu.iota {dimensions = array<i32: 0>} : vector<5x16xi32>
    %6 = vector.broadcast %3 : vector<1x16xi32> to vector<5x16xi32>
    %7 = arith.cmpi eq, %6, %5 : vector<5x16xi32>
    %c0_4 = arith.constant 0 : index
    %c0_5 = arith.constant 0 : index
    %8 = vector.load %arg5[%c0_4, %c0_5] : memref<5x32xf32, #tpu.memory_space<vmem>>, vector<5x32xf32>
    %9 = arith.extui %7 : vector<5x16xi1> to vector<5x16xi32>
    %10 = arith.sitofp %9 : vector<5x16xi32> to vector<5x16xf32>
    %cst = arith.constant dense<0.000000e+00> : vector<5x32xf32>
    %11 = tpu.matmul %10, %4, %cst {dimension_numbers = #tpu.dot_dimension_numbers<[1], [0], [0], [1], [0, 0, 1, 1], [], []>} : vector<5x16xf32>, vector<16x32xf32>, vector<5x32xf32> -> vector<5x32xf32>
    %12 = arith.addf %8, %11 : vector<5x32xf32>
    %c0_6 = arith.constant 0 : index
    %c0_7 = arith.constant 0 : index
    %13 = vector.load %arg5[%c0_6, %c0_7] : memref<5x32xf32, #tpu.memory_space<vmem>>, vector<5x32xf32>
    tpu.vector_store %arg5[%c0_6, %c0_7], %12 {strides = array<i32>} : memref<5x32xf32, #tpu.memory_space<vmem>>, vector<5x32xf32>,
    %c0_i32_8 = arith.constant 0 : i32
    %14 = arith.cmpi eq, %arg0, %c0_i32_8 : i32
    %15 = arith.extui %14 : i1 to i32
    %c0_i32_9 = arith.constant 0 : i32
    %16 = arith.cmpi ne, %15, %c0_i32_9 : i32
    scf.if %16 {
      %c0_10 = arith.constant 0 : index
      %c0_11 = arith.constant 0 : index
      %17 = vector.load %arg5[%c0_10, %c0_11] : memref<5x32xf32, #tpu.memory_space<vmem>>, vector<5x32xf32>
      %c0_12 = arith.constant 0 : index
      %c0_13 = arith.constant 0 : index
      %18 = vector.load %arg3[%c0_12, %c0_13] : memref<5x1xf32, #tpu.memory_space<vmem>>, vector<5x1xf32>
      %19 = vector.broadcast %18 : vector<5x1xf32> to vector<5x32xf32>
      %20 = arith.mulf %17, %19 : vector<5x32xf32>
      %c0_14 = arith.constant 0 : index
      %c0_15 = arith.constant 0 : index
      %21 = vector.load %arg4[%c0_14, %c0_15] : memref<5x32xf32, #tpu.memory_space<vmem>>, vector<5x32xf32>
      tpu.vector_store %arg4[%c0_14, %c0_15], %20 {strides = array<i32>} : memref<5x32xf32, #tpu.memory_space<vmem>>, vector<5x32xf32>,
    } else {
    }
    return
  }
  func.func @transform_0(%arg0: i32) -> (i32, i32) {
    %c0_i32 = arith.constant 0 : i32
    %c0_i32_0 = arith.constant 0 : i32
    return %c0_i32, %arg0 : i32, i32
  }
  func.func @transform_1(%arg0: i32) -> (i32, i32) {
    %c0_i32 = arith.constant 0 : i32
    %c0_i32_0 = arith.constant 0 : i32
    return %arg0, %c0_i32 : i32, i32
  }
  func.func @transform_2(%arg0: i32) -> (i32, i32) {
    %c0_i32 = arith.constant 0 : i32
    %c0_i32_0 = arith.constant 0 : i32
    %c0_i32_1 = arith.constant 0 : i32
    return %c0_i32, %c0_i32_0 : i32, i32
  }
  func.func @transform_3(%arg0: i32) -> (i32, i32) {
    %c0_i32 = arith.constant 0 : i32
    %c0_i32_0 = arith.constant 0 : i32
    %c0_i32_1 = arith.constant 0 : i32
    return %c0_i32, %c0_i32_0 : i32, i32
  }
}

</mosaic_0001>

<bundles_post_ra>
// kernel: pool_wrapper_forward.1
= control target key start
LH: loop header
LB: loop body
LE: loop exit
PB: predicated region body
PF: predicated region fallthrough
CT: control target
= control target key end

     0   :  { %vm19_vm0 = vcmask 258048   ;;  %v183_v2 = vmov 0.0|0.0   ;;  %v184_v4 = vmov 0.0   ;;  %vm185_vm1 = vmmov 0   ;;  %s235_s0 = inlined_call_operand.vmem [shape: s32[1,16], index: 0, kind: input, shape index: {}]   ;;  %s236_s1 = inlined_call_operand.vmem [shape: f32[16,32], index: 1, kind: input, shape index: {}]   ;;  %s237_s2 = inlined_call_operand.vmem [shape: f32[5,1], index: 2, kind: input, shape index: {}]   ;;  %s238_s3 = inlined_call_operand.hbm [shape: f32[5,32], index: 3, kind: output, shape index: {}]  }
   0x1   :  { %v22_v0 = vld [vmem:[%s236_s1] sm:$0xff]  ;;  %v23_v1 = vld [vmem:[%s236_s1 + $0x8] sm:$0xff]  ;;  %150 = vmatprep.subr.bf16.mxu0 %v183_v2  ;;  %20 = vst.msk [vmem:[#allocation2] sm:$0x1f] %vm19_vm0, %v184_v4  ;;  %147 = vmatprep.mubr.msk.f32.mxu0 %vm185_vm1, %v184_v4  ;;  %v24_v5 = vlaneseq  ;;  %v186_v8 = vmov 0  }
   0x2   :  { %v151_v3 = vpack.c.bf16 %v23_v1, %v22_v0  ;;  %v115_v6 = vld [vmem:[%s237_s2] sm:$0x1f]  ;;  %158 = vset.pattern.permute.xlu0 %v186_v8 }
   0x3   :  { %v137_v7 = vld [vmem:[%s235_s0] ss:$0 sm:$0xff] }
   0x4   :  { %8 = vsyncpa [#allocation4], 0  ;;  %152 = vmatpush3.bf16.msra.mxu0 %v151_v3  ;;  %v25_v9 = vshrl.u32 %v24_v5, 7  ;;  %118 = vperm.xlu0 %158, %v115_v6   ;;  %vm34_vm2 = vcmask 130048   ;;  %s187_s1 = smov [#allocation3]  }
   0x5   :  { %s129_s2 = sshll.u32 %s187_s1, 4  ;;  %s130_s2 = int_to_ptr.vmem [resolvable:$true] %s129_s2 }
   0x6   :  { %vm30_vm3 = vcmp.eq.s32.totalorder %v137_v7, %v25_v9  ;;  %s159_s0 = scalar_lea.vmem %s130_s2, 128  ;;  %p164_p1 = scmp.lt.s32.totalorder %s130_s2, %s130_s2 }
   0x7   :  { %v138_v10 = vsel %vm30_vm3, 1.0, %v184_v4  ;;  %p160_p0 = scmp.ne.s32.totalorder %s130_s2, %s159_s0  ;;  %p165_p2 = scmp.lt.s32.totalorder %s159_s0, %s159_s0 }
   0x8   :  { %148 = vmatmul.mubr.msk.f32.vlgmr.msra.gmra.mrb[0].mxu0 %vm34_vm2, %v138_v10  ;;  %v31_v11 = vld [vmem:[#allocation2] sm:$0x1f] }
   0x9   :  { %p166_p3 = por %p165_p2, %p164_p1 }
   0xb   :  { %p167_p4 = pnand %p166_p3, %p160_p0 }
  0x83   :  { %v119_v15 = vpop.permute.xlu0 %118 }
  0xdb   :  { %v104_v12 = vpop.f32.mrb[0].mxu0 }
  0xdc   :  { %v108_v13 = vadd.f32 %v104_v12, %v31_v11  ;;  %v149_v14 = vpop.f32.mrb[1].mxu0 }
  0xde   :  { %110 = vst.msk [vmem:[#allocation2] sm:$0x1f] %vm19_vm0, %v108_v13 }
  0xe5   :  { %v114_v16 = vld [vmem:[#allocation2] sm:$0x1f] }
  0xe6   :  { %v121_v17 = vmul.f32 %v119_v15, %v114_v16 }
  0xe8   :  { %122 = vst.msk [vmem:[#allocation3] sm:$0x1f] %vm19_vm0, %v121_v17 }
  0xe9   :  { %170 = shalt.err (!%p167_p4)
}
  0xea   :  { %s171_s22 = scalar_lea.hbm %s238_s3, 128 }
  0xeb   :  { %p172_p5 = scmp.ne.s32.totalorder %s238_s3, %s171_s22  ;;  %p175_p6 = scmp.lt.u32.totalorder %s171_s22, %s238_s3 }
  0xed   :  { %p177_p7 = pnand %p175_p6, %p172_p5 }
  0xef   :  { %180 = shalt.err (!%p177_p7)
}
  0xf0   :  { %132 = dma.vmem_to_hbm [thread:$0]  %s130_s2, 128, %s238_s3, [#allocation4]  }
  0xf1   :  { %181 = dma.done.wait [#allocation4], 128  }
  0xf2   :  { %182 = vsyncadd [#allocation4], 4294967168 }
  0xf3   :  { %136 = vsyncpa [#allocation4], 1 }

// kernel: pool_wrapper_forward.1
= control target key start
LH: loop header
LB: loop body
LE: loop exit
PB: predicated region body
PF: predicated region fallthrough
CT: control target
= control target key end

     0   :  { %vm19_vm0 = vcmask 258048   ;;  %v183_v2 = vmov 0.0|0.0   ;;  %v184_v4 = vmov 0.0   ;;  %vm185_vm1 = vmmov 0   ;;  %s235_s0 = inlined_call_operand.vmem [shape: s32[1,16], index: 0, kind: input, shape index: {}]   ;;  %s236_s1 = inlined_call_operand.vmem [shape: f32[16,32], index: 1, kind: input, shape index: {}]   ;;  %s237_s2 = inlined_call_operand.vmem [shape: f32[5,1], index: 2, kind: input, shape index: {}]   ;;  %s238_s3 = inlined_call_operand.hbm [shape: f32[5,32], index: 3, kind: output, shape index: {}]  }
   0x1   :  { %v22_v0 = vld [vmem:[%s236_s1] sm:$0xff]  ;;  %v23_v1 = vld [vmem:[%s236_s1 + $0x8] sm:$0xff]  ;;  %150 = vmatprep.subr.bf16.mxu0 %v183_v2  ;;  %20 = vst.msk [vmem:[#allocation2] sm:$0x1f] %vm19_vm0, %v184_v4  ;;  %147 = vmatprep.mubr.msk.f32.mxu0 %vm185_vm1, %v184_v4  ;;  %v24_v5 = vlaneseq  ;;  %v186_v8 = vmov 0  }
   0x2   :  { %v151_v3 = vpack.c.bf16 %v23_v1, %v22_v0  ;;  %v115_v6 = vld [vmem:[%s237_s2] sm:$0x1f]  ;;  %158 = vset.pattern.permute.xlu0 %v186_v8 }
   0x3   :  { %v137_v7 = vld [vmem:[%s235_s0] ss:$0 sm:$0xff] }
   0x4   :  { %8 = vsyncpa [#allocation4], 0  ;;  %152 = vmatpush3.bf16.msra.mxu0 %v151_v3  ;;  %v25_v9 = vshrl.u32 %v24_v5, 7  ;;  %118 = vperm.xlu0 %158, %v115_v6   ;;  %vm34_vm2 = vcmask 130048   ;;  %s187_s1 = smov [#allocation3]  }
   0x5   :  { %s129_s2 = sshll.u32 %s187_s1, 4  ;;  %s130_s2 = int_to_ptr.vmem [resolvable:$true] %s129_s2 }
   0x6   :  { %vm30_vm3 = vcmp.eq.s32.totalorder %v137_v7, %v25_v9  ;;  %s159_s0 = scalar_lea.vmem %s130_s2, 128  ;;  %p164_p1 = scmp.lt.s32.totalorder %s130_s2, %s130_s2 }
   0x7   :  { %v138_v10 = vsel %vm30_vm3, 1.0, %v184_v4  ;;  %p160_p0 = scmp.ne.s32.totalorder %s130_s2, %s159_s0  ;;  %p165_p2 = scmp.lt.s32.totalorder %s159_s0, %s159_s0 }
   0x8   :  { %148 = vmatmul.mubr.msk.f32.vlgmr.msra.gmra.mrb[0].mxu0 %vm34_vm2, %v138_v10  ;;  %v31_v11 = vld [vmem:[#allocation2] sm:$0x1f] }
   0x9   :  { %p166_p3 = por %p165_p2, %p164_p1 }
   0xb   :  { %p167_p4 = pnand %p166_p3, %p160_p0 }
  0x83   :  { %v119_v15 = vpop.permute.xlu0 %118 }
  0xdb   :  { %v104_v12 = vpop.f32.mrb[0].mxu0 }
  0xdc   :  { %v108_v13 = vadd.f32 %v104_v12, %v31_v11  ;;  %v149_v14 = vpop.f32.mrb[1].mxu0 }
  0xde   :  { %110 = vst.msk [vmem:[#allocation2] sm:$0x1f] %vm19_vm0, %v108_v13 }
  0xe5   :  { %v114_v16 = vld [vmem:[#allocation2] sm:$0x1f] }
  0xe6   :  { %v121_v17 = vmul.f32 %v119_v15, %v114_v16 }
  0xe8   :  { %122 = vst.msk [vmem:[#allocation3] sm:$0x1f] %vm19_vm0, %v121_v17 }
  0xe9   :  { %170 = shalt.err (!%p167_p4)
}
  0xea   :  { %s171_s22 = scalar_lea.hbm %s238_s3, 128 }
  0xeb   :  { %p172_p5 = scmp.ne.s32.totalorder %s238_s3, %s171_s22  ;;  %p175_p6 = scmp.lt.u32.totalorder %s171_s22, %s238_s3 }
  0xed   :  { %p177_p7 = pnand %p175_p6, %p172_p5 }
  0xef   :  { %180 = shalt.err (!%p177_p7)
}
  0xf0   :  { %132 = dma.vmem_to_hbm [thread:$0]  %s130_s2, 128, %s238_s3, [#allocation4]  }
  0xf1   :  { %181 = dma.done.wait [#allocation4], 128  }
  0xf2   :  { %182 = vsyncadd [#allocation4], 4294967168 }
  0xf3   :  { %136 = vsyncpa [#allocation4], 1 }

</bundles_post_ra>
